<compile_context>
chip_gen: v7x
topology: tpu7x:2x2x1
jax: 0.10.0
libtpu: 0.0.40
codegen_flags: <defaults>
</compile_context>

<pallas_src>
import jax
import jax.numpy as jnp
from jax.experimental import pallas as pl
from jax.experimental.pallas import tpu as pltpu

LANE = 128
SUBLANE = 8


def _round_up(n: int, m: int) -> int:
    return ((n + m - 1) // m) * m


def mlp_softmax_kernel(x_ref, w1_ref, b1_ref, w2_ref, b2_ref, mask_ref, o_ref):
    # Linear 1 + ReLU (MXU matmul with f32 accumulate; bias/ReLU on VPU in f32).
    h = jnp.dot(x_ref[...], w1_ref[...], preferred_element_type=jnp.float32)
    h = jnp.maximum(h + b1_ref[...], 0.0)            # (TB, H) + (1, H) broadcast

    # Linear 2 + ReLU.
    y = jnp.dot(h, w2_ref[...], preferred_element_type=jnp.float32)
    y = jnp.maximum(y + b2_ref[...], 0.0)            # (TB, O_p) + (1, O_p) broadcast

    # Numerically-stable softmax over the last (lane) dim.
    # After ReLU all values are >= 0 and padded lanes are exactly 0 (zero-padded w2/b2),
    # so the row max over all O_p lanes equals the max over the valid lanes.
    m = jnp.max(y, axis=-1, keepdims=True)
    e = jnp.exp(y - m) * mask_ref[...]               # zero out padded lanes exactly
    denom = jnp.sum(e, axis=-1, keepdims=True)
    o_ref[...] = (e / denom).astype(o_ref.dtype)     # exact divide: rows sum to 1


def _mlp_softmax_impl(x, w1, b1, w2, b2, *, block_b: int = 512):
    """x:(B,In), w1:(In,H), b1:(H,), w2:(H,O), b2:(O,).
    Returns softmax(relu(relu(x@w1+b1)@w2+b2), axis=-1)."""
    B, In = x.shape
    H = w1.shape[1]
    O = w2.shape[1]

    # Only the output dim is lane-padded (buys the unmasked lane-dense vst). The batch dim is
    # sublane-padded/tiled. In/H blocks equal their full array dims, which is legal.
    O_p = _round_up(O, LANE)
    TB = min(_round_up(block_b, SUBLANE), _round_up(B, SUBLANE))
    B_p = _round_up(B, TB)

    x_p = x if B_p == B else jnp.zeros((B_p, In), x.dtype).at[:B].set(x)
    b1_2d = b1.reshape(1, H)
    # Zero-padded output columns of w2/b2 give relu(0+0)=0 in the padded lanes.
    w2_p = jnp.zeros((H, O_p), w2.dtype).at[:, :O].set(w2)
    b2_p = jnp.zeros((1, O_p), b2.dtype).at[0, :O].set(b2)
    mask = jnp.zeros((1, O_p), jnp.float32).at[0, :O].set(1.0)

    out_p = pl.pallas_call(
        mlp_softmax_kernel,
        out_shape=jax.ShapeDtypeStruct((B_p, O_p), jnp.float32),
        grid=(B_p // TB,),
        in_specs=[
            pl.BlockSpec((TB, In), lambda i: (i, 0)),    # streamed, double-buffered
            pl.BlockSpec((In, H), lambda i: (0, 0)),     # weights stay VMEM-resident
            pl.BlockSpec((1, H), lambda i: (0, 0)),
            pl.BlockSpec((H, O_p), lambda i: (0, 0)),
            pl.BlockSpec((1, O_p), lambda i: (0, 0)),
            pl.BlockSpec((1, O_p), lambda i: (0, 0)),    # softmax padding mask
        ],
        out_specs=pl.BlockSpec((TB, O_p), lambda i: (i, 0)),
        compiler_params=pltpu.CompilerParams(
            # Independent batch tiles -> shard across TensorCores on v7x when grid > 1.
            dimension_semantics=("parallel",),
        ),
    )(x_p, w1, b1_2d, w2_p, b2_p, mask)

    # Slice away batch/lane padding (fused under jit; layout plumbing, not compute).
    return out_p[:B, :O]


# Jit the whole wrapper so the padding .at[].set() and the final slice fuse with the kernel call.
mlp_softmax = jax.jit(_mlp_softmax_impl, static_argnames=("block_b",))


if __name__ == "__main__":
    # Small shapes implied by the module: input_size=32, hidden_size=64, output_size=16.
    batch, input_size, hidden_size, output_size = 8, 32, 64, 16

    key = jax.random.PRNGKey(0)
    kx, kw1, kb1, kw2, kb2 = jax.random.split(key, 5)

    x = jax.random.normal(kx, (batch, input_size), dtype=jnp.float32)
    # nn.Linear computes y = x @ W^T + b; we store W already transposed to (in, out).
    w1 = jax.random.normal(kw1, (input_size, hidden_size), dtype=jnp.float32) * 0.1
    b1 = jax.random.normal(kb1, (hidden_size,), dtype=jnp.float32) * 0.1
    w2 = jax.random.normal(kw2, (hidden_size, output_size), dtype=jnp.float32) * 0.1
    b2 = jax.random.normal(kb2, (output_size,), dtype=jnp.float32) * 0.1

    out = mlp_softmax(x, w1, b1, w2, b2)
    jax.block_until_ready(out)

    # Reference check in plain JAX (torch.softmax on a 2-D input -> softmax over the last dim).
    h_ref = jnp.maximum(x @ w1 + b1, 0.0)
    y_ref = jnp.maximum(h_ref @ w2 + b2, 0.0)
    ref = jax.nn.softmax(y_ref, axis=-1)

    assert out.shape == (batch, output_size)
    assert jnp.allclose(out, ref, atol=1e-5, rtol=1e-5)
    assert jnp.allclose(jnp.sum(out, axis=-1), 1.0, atol=1e-5)

    print("KERNEL_OK")
</pallas_src>

<mosaic_0001>
module attributes {stable_mosaic.version = 11 : i64} {
  func.func @mlp_softmax_kernel(%arg0: i32, %arg1: memref<8x32xf32, #tpu.memory_space<vmem>>, %arg2: memref<32x64xf32, #tpu.memory_space<vmem>>, %arg3: memref<1x64xf32, #tpu.memory_space<vmem>>, %arg4: memref<64x128xf32, #tpu.memory_space<vmem>>, %arg5: memref<1x128xf32, #tpu.memory_space<vmem>>, %arg6: memref<1x128xf32, #tpu.memory_space<vmem>>, %arg7: memref<8x128xf32, #tpu.memory_space<vmem>>) attributes {dimension_semantics = [#tpu.dimension_semantics<parallel>], iteration_bounds = array<i64: 1>, scalar_prefetch = 0 : i64, scratch_operands = 0 : i64, tpu.core_type = #tpu.core_type<tc>, window_params = [{transform_indices = @transform_0, window_bounds = array<i64: 8, 32>}, {pipeline_mode = #tpu.pipeline_mode<synchronous>, transform_indices = @transform_1, window_bounds = array<i64: 32, 64>}, {pipeline_mode = #tpu.pipeline_mode<synchronous>, transform_indices = @transform_2, window_bounds = array<i64: 1, 64>}, {pipeline_mode = #tpu.pipeline_mode<synchronous>, transform_indices = @transform_3, window_bounds = array<i64: 64, 128>}, {pipeline_mode = #tpu.pipeline_mode<synchronous>, transform_indices = @transform_4, window_bounds = array<i64: 1, 128>}, {pipeline_mode = #tpu.pipeline_mode<synchronous>, transform_indices = @transform_5, window_bounds = array<i64: 1, 128>}, {transform_indices = @transform_6, window_bounds = array<i64: 8, 128>}]} {
    %c0 = arith.constant 0 : index
    %c0_0 = arith.constant 0 : index
    %0 = vector.load %arg1[%c0, %c0_0] : memref<8x32xf32, #tpu.memory_space<vmem>>, vector<8x32xf32>
    %c0_1 = arith.constant 0 : index
    %c0_2 = arith.constant 0 : index
    %1 = vector.load %arg2[%c0_1, %c0_2] : memref<32x64xf32, #tpu.memory_space<vmem>>, vector<32x64xf32>
    %cst = arith.constant dense<0.000000e+00> : vector<8x64xf32>
    %2 = tpu.matmul %0, %1, %cst {dimension_numbers = #tpu.dot_dimension_numbers<[1], [0], [0], [1], [0, 0, 1, 1], [], []>} : vector<8x32xf32>, vector<32x64xf32>, vector<8x64xf32> -> vector<8x64xf32>
    %c0_3 = arith.constant 0 : index
    %c0_4 = arith.constant 0 : index
    %3 = vector.load %arg3[%c0_3, %c0_4] : memref<1x64xf32, #tpu.memory_space<vmem>>, vector<1x64xf32>
    %4 = vector.broadcast %3 : vector<1x64xf32> to vector<8x64xf32>
    %5 = arith.addf %2, %4 : vector<8x64xf32>
    %cst_5 = arith.constant 0.000000e+00 : f32
    %6 = vector.broadcast %cst_5 : f32 to vector<8x64xf32>
    %7 = arith.maximumf %5, %6 : vector<8x64xf32>
    %c0_6 = arith.constant 0 : index
    %c0_7 = arith.constant 0 : index
    %8 = vector.load %arg4[%c0_6, %c0_7] : memref<64x128xf32, #tpu.memory_space<vmem>>, vector<64x128xf32>
    %cst_8 = arith.constant dense<0.000000e+00> : vector<8x128xf32>
    %9 = tpu.matmul %7, %8, %cst_8 {dimension_numbers = #tpu.dot_dimension_numbers<[1], [0], [0], [1], [0, 0, 1, 1], [], []>} : vector<8x64xf32>, vector<64x128xf32>, vector<8x128xf32> -> vector<8x128xf32>
    %c0_9 = arith.constant 0 : index
    %c0_10 = arith.constant 0 : index
    %10 = vector.load %arg5[%c0_9, %c0_10] : memref<1x128xf32, #tpu.memory_space<vmem>>, vector<1x128xf32>
    %11 = vector.broadcast %10 : vector<1x128xf32> to vector<8x128xf32>
    %12 = arith.addf %9, %11 : vector<8x128xf32>
    %cst_11 = arith.constant 0.000000e+00 : f32
    %13 = vector.broadcast %cst_11 : f32 to vector<8x128xf32>
    %14 = arith.maximumf %12, %13 : vector<8x128xf32>
    %cst_12 = arith.constant dense<0xFF800000> : vector<8xf32>
    %15 = vector.multi_reduction <maximumf>, %14, %cst_12 [1] : vector<8x128xf32> to vector<8xf32>
    %16 = vector.shape_cast %15 : vector<8xf32> to vector<8x1xf32>
    %17 = vector.broadcast %16 : vector<8x1xf32> to vector<8x128xf32>
    %18 = arith.subf %14, %17 : vector<8x128xf32>
    %19 = math.exp %18 : vector<8x128xf32>
    %c0_13 = arith.constant 0 : index
    %c0_14 = arith.constant 0 : index
    %20 = vector.load %arg6[%c0_13, %c0_14] : memref<1x128xf32, #tpu.memory_space<vmem>>, vector<1x128xf32>
    %21 = vector.broadcast %20 : vector<1x128xf32> to vector<8x128xf32>
    %22 = arith.mulf %19, %21 : vector<8x128xf32>
    %cst_15 = arith.constant dense<0.000000e+00> : vector<8xf32>
    %23 = vector.multi_reduction <add>, %22, %cst_15 [1] : vector<8x128xf32> to vector<8xf32>
    %24 = vector.shape_cast %23 : vector<8xf32> to vector<8x1xf32>
    %25 = vector.broadcast %24 : vector<8x1xf32> to vector<8x128xf32>
    %26 = arith.divf %22, %25 : vector<8x128xf32>
    %c0_16 = arith.constant 0 : index
    %c0_17 = arith.constant 0 : index
    %27 = vector.load %arg7[%c0_16, %c0_17] : memref<8x128xf32, #tpu.memory_space<vmem>>, vector<8x128xf32>
    tpu.vector_store %arg7[%c0_16, %c0_17], %26 {strides = array<i32>} : memref<8x128xf32, #tpu.memory_space<vmem>>, vector<8x128xf32>,
    return
  }
  func.func @transform_0(%arg0: i32) -> (i32, i32) {
    %c0_i32 = arith.constant 0 : i32
    %c0_i32_0 = arith.constant 0 : i32
    return %arg0, %c0_i32 : i32, i32
  }
  func.func @transform_1(%arg0: i32) -> (i32, i32) {
    %c0_i32 = arith.constant 0 : i32
    %c0_i32_0 = arith.constant 0 : i32
    %c0_i32_1 = arith.constant 0 : i32
    return %c0_i32, %c0_i32_0 : i32, i32
  }
  func.func @transform_2(%arg0: i32) -> (i32, i32) {
    %c0_i32 = arith.constant 0 : i32
    %c0_i32_0 = arith.constant 0 : i32
    %c0_i32_1 = arith.constant 0 : i32
    return %c0_i32, %c0_i32_0 : i32, i32
  }
  func.func @transform_3(%arg0: i32) -> (i32, i32) {
    %c0_i32 = arith.constant 0 : i32
    %c0_i32_0 = arith.constant 0 : i32
    %c0_i32_1 = arith.constant 0 : i32
    return %c0_i32, %c0_i32_0 : i32, i32
  }
  func.func @transform_4(%arg0: i32) -> (i32, i32) {
    %c0_i32 = arith.constant 0 : i32
    %c0_i32_0 = arith.constant 0 : i32
    %c0_i32_1 = arith.constant 0 : i32
    return %c0_i32, %c0_i32_0 : i32, i32
  }
  func.func @transform_5(%arg0: i32) -> (i32, i32) {
    %c0_i32 = arith.constant 0 : i32
    %c0_i32_0 = arith.constant 0 : i32
    %c0_i32_1 = arith.constant 0 : i32
    return %c0_i32, %c0_i32_0 : i32, i32
  }
  func.func @transform_6(%arg0: i32) -> (i32, i32) {
    %c0_i32 = arith.constant 0 : i32
    %c0_i32_0 = arith.constant 0 : i32
    return %arg0, %c0_i32 : i32, i32
  }
}

</mosaic_0001>

<bundles_post_ra>
// kernel: _mlp_softmax_impl.1
= control target key start
LH: loop header
LB: loop body
LE: loop exit
PB: predicated region body
PF: predicated region fallthrough
CT: control target
= control target key end

     0   :  { %v332_v3 = vmov 0.0|0.0   ;;  %vm333_vm0 = vmmov 0   ;;  %v334_v6 = vmov 0.0   ;;  %s431_s0 = inlined_call_operand.vmem [shape: f32[8,32], index: 0, kind: input, shape index: {}]   ;;  %s432_s1 = inlined_call_operand.vmem [shape: f32[32,64], index: 1, kind: input, shape index: {}]   ;;  %s433_s2 = inlined_call_operand.vmem [shape: f32[1,64], index: 2, kind: input, shape index: {}]   ;;  %s434_s3 = inlined_call_operand.vmem [shape: f32[64,128], index: 3, kind: input, shape index: {}]   ;;  %s435_s4 = inlined_call_operand.vmem [shape: f32[1,128], index: 4, kind: input, shape index: {}]   ;;  %s436_s5 = inlined_call_operand.vmem [shape: f32[1,128], index: 5, kind: input, shape index: {}]   ;;  %s437_s6 = inlined_call_operand.hbm [shape: f32[8,128], index: 6, kind: output, shape index: {}]  }
   0x1   :  { %v25_v0 = vld [vmem:[%s432_s1] sm:$0xff]  ;;  %v26_v1 = vld [vmem:[%s432_s1 + $0x8] sm:$0xff]  ;;  %v27_v2 = vld [vmem:[%s432_s1 + $0x10] sm:$0xff]  ;;  %282 = vmatprep.subr.bf16.mxu0 %v332_v3  ;;  %260 = vmatprep.mubr.msk.f32.mxu0 %vm333_vm0, %v334_v6 }
   0x2   :  { %v283_v4 = vpack.c.bf16 %v26_v1, %v25_v0  ;;  %v28_v5 = vld [vmem:[%s432_s1 + $0x18] sm:$0xff]  ;;  %v111_v7 = vld [vmem:[%s434_s3] sm:$0xff]  ;;  %288 = vmatprep.subr.bf16.mxu1 %v332_v3  ;;  %v112_v8 = vld [vmem:[%s434_s3 + $0x8] sm:$0xff]  ;;  %279 = vmatprep.mubr.msk.f32.mxu1 %vm333_vm0, %v334_v6 }
   0x3   :  { %v113_v9 = vld [vmem:[%s434_s3 + $0x10] sm:$0xff]  ;;  %v114_v10 = vld [vmem:[%s434_s3 + $0x18] sm:$0xff]  ;;  %v286_v11 = vpack.c.bf16 %v28_v5, %v27_v2  ;;  %v289_v12 = vpack.c.bf16 %v112_v8, %v111_v7 }
   0x4   :  { %284 = vmatpush3.bf16.msra.mxu0 %v283_v4 }
   0x5   :  { %285 = vmatprep.subr.bf16.mxu0 %v332_v3 }
   0x6   :  { %11 = vsyncpa [#allocation3], 0  ;;  %290 = vmatpush3.bf16.msra.mxu1 %v289_v12  ;;  %v292_v13 = vpack.c.bf16 %v114_v10, %v113_v9  ;;  %v115_v14 = vld [vmem:[%s434_s3 + $0x20] sm:$0xff]  ;;  %v116_v15 = vld [vmem:[%s434_s3 + $0x28] sm:$0xff]  ;;  %vm36_vm1 = vcmask 261120   ;;  %vm126_vm2 = vcmask 523264  }
   0x7   :  { %291 = vmatprep.subr.bf16.mxu1 %v332_v3  ;;  %v24_v16 = vld [vmem:[%s431_s0] sm:$0xff]  ;;  %v295_v17 = vpack.c.bf16 %v116_v15, %v115_v14  ;;  %v117_v18 = vld [vmem:[%s434_s3 + $0x30] sm:$0xff]  ;;  %v118_v19 = vld [vmem:[%s434_s3 + $0x38] sm:$0xff]  ;;  %s335_s25 = smov [#allocation2]  }
   0x8   :  { %287 = vmatpush3.bf16.msra.mxu0 %v286_v11  ;;  %v298_v20 = vpack.c.bf16 %v118_v19, %v117_v18  ;;  %v233_v21 = vld [vmem:[%s433_s2] ss:$0 sm:$0xff] }
   0x9   :  { %v235_v26 = vld [vmem:[%s435_s4] ss:$0 sm:$0xff]  ;;  %s225_s4 = sshll.u32 %s335_s25, 4  ;;  %s226_s4 = int_to_ptr.vmem [resolvable:$true] %s225_s4 }
   0xa   :  { %293 = vmatpush3.bf16.msra.mxu1 %v292_v13  ;;  %v237_v34 = vld [vmem:[%s436_s5] ss:$0 sm:$0xff]  ;;  %s308_s26 = scalar_lea.vmem %s226_s4, 128  ;;  %p313_p1 = scmp.lt.s32.totalorder %s226_s4, %s226_s4 }
   0xb   :  { %261 = vmatmul.mubr.msk.f32.vlgmr.msra.gmra.mrb[0].mxu0 %vm36_vm1, %v24_v16  ;;  %294 = vmatprep.subr.bf16.mxu1 %v332_v3  ;;  %p309_p0 = scmp.ne.s32.totalorder %s226_s4, %s308_s26  ;;  %p314_p2 = scmp.lt.s32.totalorder %s308_s26, %s308_s26 }
   0xd   :  { %p315_p3 = por %p314_p2, %p313_p1 }
   0xe   :  { %296 = vmatpush3.bf16.msra.mxu1 %v295_v17 }
   0xf   :  { %297 = vmatprep.subr.bf16.mxu1 %v332_v3  ;;  %p316_p4 = pnand %p315_p3, %p309_p0 }
  0x12   :  { %299 = vmatpush3.bf16.msra.mxu1 %v298_v20 }
  0xde   :  { %v106_v22 = vpop.f32.mrb[0].mxu0 }
  0xdf   :  { %v107_v23 = vadd.f32 %v233_v21, %v106_v22  ;;  %v262_v24 = vpop.f32.mrb[1].mxu0 }
  0xe1   :  { %v110_v25 = vmax.f32 %v107_v23, 0.0 }
  0xe3   :  { %280 = vmatmul.mubr.msk.f32.vlgmr.msra.gmra.mrb[0].mxu1 %vm126_vm2, %v110_v25 }
 0x1b6   :  { %v196_v27 = vpop.f32.mrb[0].mxu1 }
 0x1b7   :  { %v197_v28 = vadd.f32 %v235_v26, %v196_v27  ;;  %v281_v29 = vpop.f32.mrb[1].mxu1 }
 0x1b9   :  { %v200_v30 = vmax.f32 %v197_v28, 0.0 }
 0x1bb   :  { %201 = vmax.xlane.f32.xlu0 %v200_v30 }
 0x248   :  { %v202_v31 = vpop.xlane.xlu0 %201 }
 0x249   :  { %v203_v32 = vsub.f32 %v200_v30, %v202_v31 }
 0x24b   :  { %v204_v33 = vmul.f32 1.442695, %v203_v32 }
 0x24d   :  { %304 = vpow2.f32 %v204_v33 }
 0x257   :  { %v305_v35 = vpop.eup %304 }
 0x258   :  { %v213_v36 = vmul.f32 %v305_v35, %v237_v34 }
 0x25a   :  { %214 = vadd.xlane.f32.xlu0 %v213_v36 }
 0x2e7   :  { %v215_v37 = vpop.xlane.xlu0 %214 }
 0x2e8   :  { %306 = vrcp.f32 %v215_v37 }
 0x2f2   :  { %v307_v38 = vpop.eup %306 }
 0x2f3   :  { %v217_v39 = vmul.f32 %v307_v38, %v213_v36 }
 0x2f5   :  { %218 = vst [vmem:[#allocation2] sm:$0xff] %v217_v39 }
 0x2f6   :  { %319 = shalt.err (!%p316_p4)
}
 0x2f7   :  { %s320_s28 = scalar_lea.hbm %s437_s6, 128 }
 0x2f8   :  { %p321_p5 = scmp.ne.s32.totalorder %s437_s6, %s320_s28  ;;  %p324_p6 = scmp.lt.u32.totalorder %s320_s28, %s437_s6 }
 0x2fa   :  { %p326_p7 = pnand %p324_p6, %p321_p5 }
 0x2fc   :  { %329 = shalt.err (!%p326_p7)
}
 0x2fd   :  { %228 = dma.vmem_to_hbm [thread:$0]  %s226_s4, 128, %s437_s6, [#allocation3]  }
 0x2fe   :  { %330 = dma.done.wait [#allocation3], 128  }
 0x2ff   :  { %331 = vsyncadd [#allocation3], 4294967168 }
 0x300   :  { %232 = vsyncpa [#allocation3], 1 }

</bundles_post_ra>
